<compile_context>
chip_gen: v7x
topology: tpu7x:2x2x1
jax: 0.10.0
libtpu: 0.0.40
codegen_flags: <defaults>
</compile_context>

<pallas_src>
import jax
import jax.numpy as jnp
from jax.experimental import pallas as pl
from jax.experimental.pallas import tpu as pltpu
from jax.scipy.linalg import block_diag


def gst_attn_kernel(x_ref, a_ref, v_ref, g_ref, o_ref):
    """Fused GST attention for one lane-dense batch tile (all operands in VMEM).

    x_ref : [tn, R*dq]     R batch rows packed per sublane row
    a_ref : [R*dq, R*H*T]  block-diag( W_q folded into per-head K^T, scale incl.)
    v_ref : [R*H*T, R*E]   block-diag per-(row, head) value matrices
    g_ref : [R*H*T, R*E]   per-(row, head) segment-sum (ones) matrix
    o_ref : [tn, R*E]      packed multi-head attention output
    """
    x = x_ref[...]
    # All heads' (scaled) attention scores for all packed rows in one matmul.
    s = jnp.dot(x, a_ref[...], preferred_element_type=jnp.float32)   # [tn, R*H*T]
    # Per-row max is constant within every (row, head) softmax segment, so
    # subtracting it leaves each segment's softmax exactly unchanged while
    # guarding exp against overflow.
    s = s - jnp.max(s, axis=-1, keepdims=True)
    e = jnp.exp(s)                                                    # EUP
    # Numerator (already the concatenated per-head output layout) and the
    # per-segment denominator broadcast over each head's output lanes — both as
    # single full-width MXU matmuls; no slices / concats / relayouts.
    num = jnp.dot(e, v_ref[...], preferred_element_type=jnp.float32)  # [tn, R*E]
    den = jnp.dot(e, g_ref[...], preferred_element_type=jnp.float32)  # [tn, R*E]
    o_ref[...] = (num * pl.reciprocal(den, approx=True)).astype(o_ref.dtype)


def _fold_params(embed, wq_t, wk_t, wv_t, *, num_heads, repack):
    """Batch-independent parameter preprocessing (hoisted out of the kernel)."""
    T, _ = embed.shape
    dq, E = wq_t.shape
    H = num_heads
    dh = E // H
    scale = 1.0 / float(dh) ** 0.5            # torch: self.key_dim = E // num_heads

    keys = jnp.tanh(embed.astype(jnp.float32))                  # [T, d_k]
    k = keys @ wk_t.astype(jnp.float32)                         # [T, E]
    v = keys @ wv_t.astype(jnp.float32)                         # [T, E]
    kh = k.reshape(T, H, dh)                                    # [T, H, dh]
    vh = v.reshape(T, H, dh)                                    # [T, H, dh]
    wqh = wq_t.astype(jnp.float32).reshape(dq, H, dh)           # [dq, H, dh]

    # Fold W_query into per-head K^T (scale included):
    #   scores_h = (x @ Wq_h) @ K_h^T * scale = x @ A[:, h*T:(h+1)*T]
    a = (jnp.einsum("qhd,thd->qht", wqh, kh) * scale).reshape(dq, H * T)

    # Block-diagonal V:  p_all @ v_blk == concat_h(softmax_h @ V_h)
    v_blk = block_diag(*[vh[:, h, :] for h in range(H)])                 # [H*T, E]
    # Segment-sum matrix in OUTPUT-column layout: (exp(s) @ g_blk) broadcasts each
    # head's softmax denominator over that head's dh output lanes.
    g_blk = block_diag(*([jnp.ones((T, dh), jnp.float32)] * H))          # [H*T, E]

    if repack > 1:  # 8-way lane-dense expansion (one block per packed batch row)
        a = block_diag(*([a] * repack))            # [R*dq, R*H*T]
        v_blk = block_diag(*([v_blk] * repack))    # [R*H*T, R*E]
        g_blk = block_diag(*([g_blk] * repack))    # [R*H*T, R*E]
    return a, v_blk, g_blk


def gst_forward(inputs, embed, wq_t, wk_t, wv_t, *, num_heads, tile_n=8192):
    """inputs: [N, E//2] -> style embedding [N, 1, E] (matches the torch module)."""
    N, dq = inputs.shape
    E = wq_t.shape[1]
    H = num_heads
    T = embed.shape[0]
    HT = H * T

    # Lane-dense repack factor: pack R batch rows per sublane row so the input
    # block is a full 128 lanes wide and the output block R*E lanes wide
    # (unmasked stores, efficient DMA rows, no VMEM lane-padding inflation).
    R = 128 // dq if (0 < dq <= 128 and 128 % dq == 0) else 1

    a, v_blk, g_blk = _fold_params(embed, wq_t, wk_t, wv_t,
                                   num_heads=H, repack=R)

    # ---- batch tiling over packed rows ----
    rows = (N + R - 1) // R                     # packed rows needed
    tile_rows = max(1, tile_n // R)             # packed rows per grid step
    if rows <= tile_rows:
        if rows >= 16:
            # at least 2 grid steps so both TensorCores get work on v7x
            tn = max(8, (((rows + 1) // 2) + 7) // 8 * 8)
        else:
            tn = rows                            # single small block (== full dim)
    else:
        tn = max(8, (tile_rows // 8) * 8)
    grid = (rows + tn - 1) // tn
    rows_pad = grid * tn
    n_pad = rows_pad * R

    x = inputs.astype(jnp.float32)
    if n_pad != N:
        x = jnp.pad(x, ((0, n_pad - N), (0, 0)))
    x_packed = x.reshape(rows_pad, R * dq)       # free contiguous reshape in HBM

    out_packed = pl.pallas_call(
        gst_attn_kernel,
        out_shape=jax.ShapeDtypeStruct((rows_pad, R * E), jnp.float32),
        grid=(grid,),
        in_specs=[
            pl.BlockSpec((tn, R * dq), lambda i: (i, 0)),       # streamed batch tile
            pl.BlockSpec((R * dq, R * HT), lambda i: (0, 0)),   # resident folded Wq.K^T
            pl.BlockSpec((R * HT, R * E), lambda i: (0, 0)),    # resident block-diag V
            pl.BlockSpec((R * HT, R * E), lambda i: (0, 0)),    # resident segment-sum ones
        ],
        out_specs=pl.BlockSpec((tn, R * E), lambda i: (i, 0)),
        compiler_params=pltpu.CompilerParams(
            dimension_semantics=("parallel",)),                 # dual-TC sharding on v7x
    )(x_packed, a, v_blk, g_blk)

    out = out_packed.reshape(n_pad, E)[:N]       # free reshape; drop padding
    return out.reshape(N, 1, E)


def gst_reference(inputs, embed, wq_t, wk_t, wv_t, *, num_heads):
    """Pure-JAX reference mirroring the PyTorch forward, for validation."""
    N = inputs.shape[0]
    E = wq_t.shape[1]
    dh = E // num_heads
    keys = jnp.tanh(embed)
    q = inputs @ wq_t
    k = keys @ wk_t
    v = keys @ wv_t
    outs = []
    for h in range(num_heads):
        sl = slice(h * dh, (h + 1) * dh)
        s = (q[:, sl] @ k[:, sl].T) / (dh ** 0.5)   # torch key_dim = E // num_heads
        p = jax.nn.softmax(s, axis=-1)
        outs.append(p @ v[:, sl])
    return jnp.concatenate(outs, axis=-1).reshape(N, 1, E)


if __name__ == "__main__":
    # Module-consistent shapes: GST(token_num=8, E=32, num_heads=4), batch=2.
    N = 2
    E = 32
    num_heads = 4
    token_num = 8
    d_q = E // 2             # query_dim = 16
    d_k = E // num_heads     # key_dim   = 8

    key = jax.random.PRNGKey(0)
    k_in, k_emb, k_wq, k_wk, k_wv, k_in2 = jax.random.split(key, 6)

    inputs = jax.random.normal(k_in, (N, d_q), dtype=jnp.float32)

    # Deterministic synthetic parameters (no checkpoint load).
    # embed ~ Normal(0, 0.5) as in init.normal_(self.embed, mean=0, std=0.5).
    embed = 0.5 * jax.random.normal(k_emb, (token_num, d_k), dtype=jnp.float32)
    # nn.Linear-style uniform(-1/sqrt(fan_in), 1/sqrt(fan_in)); stored as [in, out].
    wq_t = jax.random.uniform(k_wq, (d_q, E), jnp.float32,
                              minval=-1.0 / d_q ** 0.5, maxval=1.0 / d_q ** 0.5)
    wk_t = jax.random.uniform(k_wk, (d_k, E), jnp.float32,
                              minval=-1.0 / d_k ** 0.5, maxval=1.0 / d_k ** 0.5)
    wv_t = jax.random.uniform(k_wv, (d_k, E), jnp.float32,
                              minval=-1.0 / d_k ** 0.5, maxval=1.0 / d_k ** 0.5)

    # Case 1: tiny batch (single packed block).
    out = gst_forward(inputs, embed, wq_t, wk_t, wv_t, num_heads=num_heads)
    out = jax.block_until_ready(out)
    ref = gst_reference(inputs, embed, wq_t, wk_t, wv_t, num_heads=num_heads)
    assert out.shape == (N, 1, E), out.shape
    # Tolerance covers the EUP approximate-reciprocal softmax denominator.
    assert jnp.allclose(out, ref, atol=5e-3, rtol=5e-3), "mismatch vs reference (N=2)"

    # Case 2: exercises batch padding + the multi-step "parallel" grid path.
    N2 = 300
    inputs2 = jax.random.normal(k_in2, (N2, d_q), dtype=jnp.float32)
    out2 = jax.block_until_ready(
        gst_forward(inputs2, embed, wq_t, wk_t, wv_t, num_heads=num_heads))
    ref2 = gst_reference(inputs2, embed, wq_t, wk_t, wv_t, num_heads=num_heads)
    assert out2.shape == (N2, 1, E), out2.shape
    assert jnp.allclose(out2, ref2, atol=5e-3, rtol=5e-3), "mismatch vs reference (N=300)"

    print("KERNEL_OK")
</pallas_src>

<mosaic_0001>
module attributes {stable_mosaic.version = 11 : i64} {
  func.func @gst_attn_kernel(%arg0: i32, %arg1: memref<1x128xf32, #tpu.memory_space<vmem>>, %arg2: memref<128x256xf32, #tpu.memory_space<vmem>>, %arg3: memref<256x256xf32, #tpu.memory_space<vmem>>, %arg4: memref<256x256xf32, #tpu.memory_space<vmem>>, %arg5: memref<1x256xf32, #tpu.memory_space<vmem>>) attributes {dimension_semantics = [#tpu.dimension_semantics<parallel>], iteration_bounds = array<i64: 1>, scalar_prefetch = 0 : i64, scratch_operands = 0 : i64, tpu.core_type = #tpu.core_type<tc>, window_params = [{transform_indices = @transform_0, window_bounds = array<i64: 1, 128>}, {pipeline_mode = #tpu.pipeline_mode<synchronous>, transform_indices = @transform_1, window_bounds = array<i64: 128, 256>}, {pipeline_mode = #tpu.pipeline_mode<synchronous>, transform_indices = @transform_2, window_bounds = array<i64: 256, 256>}, {pipeline_mode = #tpu.pipeline_mode<synchronous>, transform_indices = @transform_3, window_bounds = array<i64: 256, 256>}, {transform_indices = @transform_4, window_bounds = array<i64: 1, 256>}]} {
    %c0 = arith.constant 0 : index
    %c0_0 = arith.constant 0 : index
    %0 = vector.load %arg1[%c0, %c0_0] : memref<1x128xf32, #tpu.memory_space<vmem>>, vector<1x128xf32>
    %c0_1 = arith.constant 0 : index
    %c0_2 = arith.constant 0 : index
    %1 = vector.load %arg2[%c0_1, %c0_2] : memref<128x256xf32, #tpu.memory_space<vmem>>, vector<128x256xf32>
    %cst = arith.constant dense<0.000000e+00> : vector<1x256xf32>
    %2 = tpu.matmul %0, %1, %cst {dimension_numbers = #tpu.dot_dimension_numbers<[1], [0], [0], [1], [0, 0, 1, 1], [], []>} : vector<1x128xf32>, vector<128x256xf32>, vector<1x256xf32> -> vector<1x256xf32>
    %cst_3 = arith.constant dense<0xFF800000> : vector<1xf32>
    %3 = vector.multi_reduction <maximumf>, %2, %cst_3 [1] : vector<1x256xf32> to vector<1xf32>
    %4 = vector.shape_cast %3 : vector<1xf32> to vector<1x1xf32>
    %5 = vector.broadcast %4 : vector<1x1xf32> to vector<1x256xf32>
    %6 = arith.subf %2, %5 : vector<1x256xf32>
    %7 = math.exp %6 : vector<1x256xf32>
    %c0_4 = arith.constant 0 : index
    %c0_5 = arith.constant 0 : index
    %8 = vector.load %arg3[%c0_4, %c0_5] : memref<256x256xf32, #tpu.memory_space<vmem>>, vector<256x256xf32>
    %cst_6 = arith.constant dense<0.000000e+00> : vector<1x256xf32>
    %9 = tpu.matmul %7, %8, %cst_6 {dimension_numbers = #tpu.dot_dimension_numbers<[1], [0], [0], [1], [0, 0, 1, 1], [], []>} : vector<1x256xf32>, vector<256x256xf32>, vector<1x256xf32> -> vector<1x256xf32>
    %c0_7 = arith.constant 0 : index
    %c0_8 = arith.constant 0 : index
    %10 = vector.load %arg4[%c0_7, %c0_8] : memref<256x256xf32, #tpu.memory_space<vmem>>, vector<256x256xf32>
    %cst_9 = arith.constant dense<0.000000e+00> : vector<1x256xf32>
    %11 = tpu.matmul %7, %10, %cst_9 {dimension_numbers = #tpu.dot_dimension_numbers<[1], [0], [0], [1], [0, 0, 1, 1], [], []>} : vector<1x256xf32>, vector<256x256xf32>, vector<1x256xf32> -> vector<1x256xf32>
    %12 = tpu.reciprocal %11 {approx = true} : vector<1x256xf32> -> vector<1x256xf32>
    %13 = arith.mulf %9, %12 : vector<1x256xf32>
    %c0_10 = arith.constant 0 : index
    %c0_11 = arith.constant 0 : index
    %14 = vector.load %arg5[%c0_10, %c0_11] : memref<1x256xf32, #tpu.memory_space<vmem>>, vector<1x256xf32>
    tpu.vector_store %arg5[%c0_10, %c0_11], %13 {strides = array<i32>} : memref<1x256xf32, #tpu.memory_space<vmem>>, vector<1x256xf32>,
    return
  }
  func.func @transform_0(%arg0: i32) -> (i32, i32) {
    %c0_i32 = arith.constant 0 : i32
    %c0_i32_0 = arith.constant 0 : i32
    return %arg0, %c0_i32 : i32, i32
  }
  func.func @transform_1(%arg0: i32) -> (i32, i32) {
    %c0_i32 = arith.constant 0 : i32
    %c0_i32_0 = arith.constant 0 : i32
    %c0_i32_1 = arith.constant 0 : i32
    return %c0_i32, %c0_i32_0 : i32, i32
  }
  func.func @transform_2(%arg0: i32) -> (i32, i32) {
    %c0_i32 = arith.constant 0 : i32
    %c0_i32_0 = arith.constant 0 : i32
    %c0_i32_1 = arith.constant 0 : i32
    return %c0_i32, %c0_i32_0 : i32, i32
  }
  func.func @transform_3(%arg0: i32) -> (i32, i32) {
    %c0_i32 = arith.constant 0 : i32
    %c0_i32_0 = arith.constant 0 : i32
    %c0_i32_1 = arith.constant 0 : i32
    return %c0_i32, %c0_i32_0 : i32, i32
  }
  func.func @transform_4(%arg0: i32) -> (i32, i32) {
    %c0_i32 = arith.constant 0 : i32
    %c0_i32_0 = arith.constant 0 : i32
    return %arg0, %c0_i32 : i32, i32
  }
}

</mosaic_0001>

<bundles_post_ra>
// kernel: tpu_custom_call.1
= control target key start
LH: loop header
LB: loop body
LE: loop exit
PB: predicated region body
PF: predicated region fallthrough
CT: control target
= control target key end

     0   :  { %9 = vsyncpa [#allocation3], 0  ;;  %s907_s0 = inlined_call_operand.hbm [shape: f32[1,128], index: 0, kind: input, shape index: {}]   ;;  %s908_s1 = inlined_call_operand.hbm [shape: f32[128,256], index: 1, kind: input, shape index: {}]   ;;  %s909_s2 = inlined_call_operand.hbm [shape: f32[256,256], index: 2, kind: input, shape index: {}]   ;;  %s910_s3 = inlined_call_operand.hbm [shape: f32[256,256], index: 3, kind: input, shape index: {}]   ;;  %s911_s4 = inlined_call_operand.hbm [shape: f32[1,256], index: 4, kind: output, shape index: {}]  }
   0x1   :  { %10 = vsyncpa [#allocation6], 0 }
   0x2   :  { %11 = vsyncpa [#allocation9], 0 }
   0x3   :  { %12 = vsyncpa [#allocation4], 0  ;;  %s796_s15 = smov [#allocation5]   ;;  %s678_s19 = scalar_lea.hbm %s908_s1, 4096 }
   0x4   :  { %s28_s16 = sshll.u32 %s796_s15, 4  ;;  %p679_p0 = scmp.ne.s32.totalorder %s908_s1, %s678_s19  ;;  %s29_s16 = int_to_ptr.vmem [resolvable:$true] %s28_s16 }
   0x5   :  { %p682_p1 = scmp.lt.u32.totalorder %s678_s19, %s908_s1 }
   0x7   :  { %p684_p2 = pnand %p682_p1, %p679_p0 }
   0x9   :  { %687 = shalt.err (!%p684_p2)
}
   0xa   :  { %s688_s24 = scalar_lea.vmem %s29_s16, 4096  ;;  %p693_p4 = scmp.lt.s32.totalorder %s29_s16, %s29_s16 }
   0xb   :  { %p689_p3 = scmp.ne.s32.totalorder %s29_s16, %s688_s24  ;;  %p694_p5 = scmp.lt.s32.totalorder %s688_s24, %s688_s24 }
   0xd   :  { %p695_p6 = por %p694_p5, %p693_p4 }
   0xf   :  { %p696_p7 = pnand %p695_p6, %p689_p3 }
  0x11   :  { %699 = shalt.err (!%p696_p7)
}
  0x12   :  { %s797_s25 = smov 256   ;;  %s798_s26 = smov 16  }
  0x13   :  { %34 = dma.hbm_to_vmem [thread:$0]  %s908_s1, 4096, %s29_s16, [#allocation6], %s797_s25, %s797_s25, %s798_s26  }
  0x14   :  { %s799_s29 = smov [#allocation2]   ;;  %s800_s5 = smov [#allocation7]  }
  0x15   :  { %s19_s30 = sshll.u32 %s799_s29, 4  ;;  %s40_s6 = sshll.u32 %s800_s5, 4  ;;  %s20_s30 = int_to_ptr.vmem [resolvable:$true] %s19_s30  ;;  %s41_s6 = int_to_ptr.vmem [resolvable:$true] %s40_s6 }
  0x16   :  { %s700_s9 = scalar_lea.hbm %s907_s0, 16 }
  0x17   :  { %p701_p8 = scmp.ne.s32.totalorder %s907_s0, %s700_s9  ;;  %p704_p9 = scmp.lt.u32.totalorder %s700_s9, %s907_s0 }
  0x19   :  { %p706_p10 = pnand %p704_p9, %p701_p8 }
  0x1b   :  { %709 = shalt.err (!%p706_p10)
}
  0x1c   :  { %s710_s1 = scalar_lea.vmem %s20_s30, 16  ;;  %s714_s14 = scalar_lea.vmem %s20_s30, 32 }
  0x1d   :  { %p711_p11 = scmp.ne.s32.totalorder %s20_s30, %s710_s1  ;;  %p715_p12 = scmp.lt.s32.totalorder %s20_s30, %s20_s30 }
  0x1e   :  { %p716_p13 = scmp.lt.s32.totalorder %s714_s14, %s710_s1 }
  0x20   :  { %p717_p0 = por %p716_p13, %p715_p12 }
  0x22   :  { %p718_p1 = pnand %p717_p0, %p711_p11 }
  0x24   :  { %721 = shalt.err (!%p718_p1)
}
  0x25   :  { %22 = dma.hbm_to_vmem [thread:$0]  %s907_s0, 16, %s20_s30, [#allocation3]  }
  0x26   :  { %s722_s19 = scalar_lea.hbm %s909_s2, 8192 }
  0x27   :  { %p723_p2 = scmp.ne.s32.totalorder %s909_s2, %s722_s19  ;;  %p726_p3 = scmp.lt.u32.totalorder %s722_s19, %s909_s2 }
  0x29   :  { %p728_p4 = pnand %p726_p3, %p723_p2 }
  0x2b   :  { %731 = shalt.err (!%p728_p4)
}
  0x2c   :  { %s732_s24 = scalar_lea.vmem %s41_s6, 8192  ;;  %p737_p6 = scmp.lt.s32.totalorder %s41_s6, %s41_s6 }
  0x2d   :  { %p733_p5 = scmp.ne.s32.totalorder %s41_s6, %s732_s24  ;;  %p738_p7 = scmp.lt.s32.totalorder %s732_s24, %s732_s24 }
  0x2f   :  { %p739_p8 = por %p738_p7, %p737_p6 }
  0x31   :  { %p740_p9 = pnand %p739_p8, %p733_p5 }
  0x33   :  { %743 = shalt.err (!%p740_p9)
}
  0x34   :  { %46 = dma.hbm_to_vmem [thread:$0]  %s909_s2, 8192, %s41_s6, [#allocation6], %s797_s25, %s797_s25, %s798_s26  }
  0x35   :  { %s801_s28 = smov [#allocation8]   ;;  %s744_s7 = scalar_lea.hbm %s910_s3, 8192 }
  0x36   :  { %s52_s29 = sshll.u32 %s801_s28, 4  ;;  %p745_p10 = scmp.ne.s32.totalorder %s910_s3, %s744_s7  ;;  %s53_s29 = int_to_ptr.vmem [resolvable:$true] %s52_s29 }
  0x37   :  { %p748_p11 = scmp.lt.u32.totalorder %s744_s7, %s910_s3 }
  0x39   :  { %p750_p12 = pnand %p748_p11, %p745_p10 }
  0x3b   :  { %753 = shalt.err (!%p750_p12)
}
  0x3c   :  { %s754_s12 = scalar_lea.vmem %s53_s29, 8192  ;;  %p759_p0 = scmp.lt.s32.totalorder %s53_s29, %s53_s29 }
  0x3d   :  { %p755_p13 = scmp.ne.s32.totalorder %s53_s29, %s754_s12  ;;  %p760_p1 = scmp.lt.s32.totalorder %s754_s12, %s754_s12 }
  0x3f   :  { %p761_p2 = por %p760_p1, %p759_p0 }
  0x41   :  { %p762_p3 = pnand %p761_p2, %p755_p13 }
  0x43   :  { %765 = shalt.err (!%p762_p3)
}
  0x44   :  { %58 = dma.hbm_to_vmem [thread:$0]  %s910_s3, 8192, %s53_s29, [#allocation9], %s797_s25, %s797_s25, %s798_s26  }
  0x45   :  { %788 = dma.done.wait [#allocation3], 16  }
  0x46   :  { %789 = vsyncadd [#allocation3], 4294967280 }
  0x47   :  { %790 = dma.done.wait [#allocation6], 12288  }
  0x48   :  { %791 = vsyncadd [#allocation6], 4294955008 }
  0x49   :  { %792 = dma.done.wait [#allocation9], 8192  }
  0x4a   :  { %793 = vsyncadd [#allocation9], 4294959104  ;;  %v802_v0 = vmov 0.0   ;;  %v73_v1 = vld [vmem:[#allocation5 + $0x8] sm:$0xff]  ;;  %v75_v2 = vld [vmem:[#allocation5 + $0x18] sm:$0xff]  ;;  %vm175_vm0 = vcmask 1040384  }
  0x4b   :  { %168 = vmatprep.mubr.f32.mxu0 %v802_v0  ;;  %v72_v3 = vld [vmem:[#allocation5] sm:$0xff]  ;;  %v501_v4 = vpack.c.bf16 %v75_v2, %v73_v1  ;;  %v74_v5 = vld [vmem:[#allocation5 + $0x10] sm:$0xff]  ;;  %v77_v6 = vld [vmem:[#allocation5 + $0x28] sm:$0xff]  ;;  %s804_s3 = smov [#allocation10]  }
  0x4c   :  { %v79_v7 = vld [vmem:[#allocation5 + $0x38] sm:$0xff]  ;;  %v503_v8 = vpack.c.bf16 %v74_v5, %v72_v3  ;;  %v76_v10 = vld [vmem:[#allocation5 + $0x20] sm:$0xff]  ;;  %v78_v11 = vld [vmem:[#allocation5 + $0x30] sm:$0xff]  ;;  %s490_s25 = sshll.u32 %s804_s3, 4  ;;  %s491_s25 = int_to_ptr.vmem [resolvable:$true] %s490_s25 }
  0x4d   :  { %v505_v9 = vpack.c.bf16 %v79_v7, %v77_v6  ;;  %v81_v12 = vld [vmem:[#allocation5 + $0x48] sm:$0xff]  ;;  %502 = vmatprep.subr.bf16.mxu0 %v501_v4  ;;  %v83_v13 = vld [vmem:[#allocation5 + $0x58] sm:$0xff]  ;;  %v507_v14 = vpack.c.bf16 %v78_v11, %v76_v10  ;;  %v80_v16 = vld [vmem:[#allocation5 + $0x40] sm:$0xff]  ;;  %s766_s26 = scalar_lea.vmem %s491_s25, 32  ;;  %p771_p5 = scmp.lt.s32.totalorder %s491_s25, %s491_s25 }
  0x4e   :  { %504 = vmatpush1.bf16.msra.mxu0 %v503_v8  ;;  %v509_v15 = vpack.c.bf16 %v83_v13, %v81_v12  ;;  %v82_v17 = vld [vmem:[#allocation5 + $0x50] sm:$0xff]  ;;  %v85_v18 = vld [vmem:[#allocation5 + $0x68] sm:$0xff]  ;;  %v87_v19 = vld [vmem:[#allocation5 + $0x78] sm:$0xff]  ;;  %p767_p4 = scmp.ne.s32.totalorder %s491_s25, %s766_s26  ;;  %p772_p6 = scmp.lt.s32.totalorder %s766_s26, %s766_s26 }
  0x4f   :  { %506 = vmatprep.subr.bf16.mxu0 %v505_v9  ;;  %v511_v20 = vpack.c.bf16 %v82_v17, %v80_v16  ;;  %v513_v21 = vpack.c.bf16 %v87_v19, %v85_v18  ;;  %v84_v22 = vld [vmem:[#allocation5 + $0x60] sm:$0xff]  ;;  %v86_v23 = vld [vmem:[#allocation5 + $0x70] sm:$0xff]  ;;  %v89_v24 = vld [vmem:[#allocation5 + $0x88] sm:$0xff] }
  0x50   :  { %v91_v25 = vld [vmem:[#allocation5 + $0x98] sm:$0xff]  ;;  %v515_v26 = vpack.c.bf16 %v86_v23, %v84_v22  ;;  %v88_v28 = vld [vmem:[#allocation5 + $0x80] sm:$0xff]  ;;  %v90_v29 = vld [vmem:[#allocation5 + $0x90] sm:$0xff]  ;;  %p773_p7 = por %p772_p6, %p771_p5 }
  0x51   :  { %v517_v27 = vpack.c.bf16 %v91_v25, %v89_v24  ;;  %v93_v30 = vld [vmem:[#allocation5 + $0xa8] sm:$0xff]  ;;  %v95_v31 = vld [vmem:[#allocation5 + $0xb8] sm:$0xff]  ;;  %v519_v32 = vpack.c.bf16 %v90_v29, %v88_v28  ;;  %v92_v34 = vld [vmem:[#allocation5 + $0xa0] sm:$0xff] }
  0x52   :  { %508 = vmatpush1.bf16.msra.mxu0 %v507_v14  ;;  %v521_v33 = vpack.c.bf16 %v95_v31, %v93_v30  ;;  %v94_v35 = vld [vmem:[#allocation5 + $0xb0] sm:$0xff]  ;;  %v97_v36 = vld [vmem:[#allocation5 + $0xc8] sm:$0xff]  ;;  %v99_v37 = vld [vmem:[#allocation5 + $0xd8] sm:$0xff]  ;;  %p774_p8 = pnand %p773_p7, %p767_p4 }
  0x53   :  { %510 = vmatprep.subr.bf16.mxu0 %v509_v15  ;;  %v523_v38 = vpack.c.bf16 %v94_v35, %v92_v34  ;;  %v525_v39 = vpack.c.bf16 %v99_v37, %v97_v36  ;;  %v96_v40 = vld [vmem:[#allocation5 + $0xc0] sm:$0xff]  ;;  %v98_v41 = vld [vmem:[#allocation5 + $0xd0] sm:$0xff]  ;;  %v101_v42 = vld [vmem:[#allocation5 + $0xe8] sm:$0xff] }
  0x54   :  { %v103_v43 = vld [vmem:[#allocation5 + $0xf8] sm:$0xff]  ;;  %v527_v44 = vpack.c.bf16 %v98_v41, %v96_v40  ;;  %v100_v46 = vld [vmem:[#allocation5 + $0xe0] sm:$0xff]  ;;  %v102_v47 = vld [vmem:[#allocation5 + $0xf0] sm:$0xff] }
  0x55   :  { %v529_v45 = vpack.c.bf16 %v103_v43, %v101_v42  ;;  %v531_v48 = vpack.c.bf16 %v102_v47, %v100_v46  ;;  %v71_v49 = vld [vmem:[#allocation2] sm:$0x1]  ;;  %v188_v50 = vld [vmem:[#allocation7 + $0x8] sm:$0xff]  ;;  %v187_v55 = vld [vmem:[#allocation7] sm:$0xff] }
  0x56   :  { %512 = vmatpush1.bf16.msra.mxu0 %v511_v20  ;;  %v190_v51 = vld [vmem:[#allocation7 + $0x18] sm:$0xff]  ;;  %v323_v52 = vld [vmem:[#allocation8 + $0x8] sm:$0xff]  ;;  %v189_v56 = vld [vmem:[#allocation7 + $0x10] sm:$0xff] }
  0x57   :  { %514 = vmatprep.subr.bf16.mxu0 %v513_v21  ;;  %v533_v53 = vpack.c.bf16 %v190_v51, %v188_v50  ;;  %v325_v54 = vld [vmem:[#allocation8 + $0x18] sm:$0xff]  ;;  %v535_v58 = vpack.c.bf16 %v189_v56, %v187_v55  ;;  %v322_v59 = vld [vmem:[#allocation8] sm:$0xff]  ;;  %v324_v60 = vld [vmem:[#allocation8 + $0x10] sm:$0xff] }
  0x58   :  { %v597_v57 = vpack.c.bf16 %v325_v54, %v323_v52  ;;  %v192_v61 = vld [vmem:[#allocation7 + $0x28] sm:$0xff]  ;;  %v599_v62 = vpack.c.bf16 %v324_v60, %v322_v59  ;;  %v194_v63 = vld [vmem:[#allocation7 + $0x38] sm:$0xff]  ;;  %v191_v4 = vld [vmem:[#allocation7 + $0x20] sm:$0xff] }
  0x59   :  { %534 = vmatprep.subr.bf16.mxu1 %v533_v53  ;;  %v327_v0 = vld [vmem:[#allocation8 + $0x28] sm:$0xff]  ;;  %v329_v1 = vld [vmem:[#allocation8 + $0x38] sm:$0xff]  ;;  %v537_v2 = vpack.c.bf16 %v194_v63, %v192_v61  ;;  %v193_v5 = vld [vmem:[#allocation7 + $0x30] sm:$0xff] }
  0x5a   :  { %516 = vmatpush1.bf16.msra.mxu0 %v515_v26  ;;  %536 = vmatpush1.bf16.msra.mxu1 %v535_v58  ;;  %v601_v3 = vpack.c.bf16 %v329_v1, %v327_v0  ;;  %v326_v6 = vld [vmem:[#allocation8 + $0x20] sm:$0xff]  ;;  %v539_v7 = vpack.c.bf16 %v193_v5, %v191_v4  ;;  %v328_v8 = vld [vmem:[#allocation8 + $0x30] sm:$0xff]  ;;  %v196_v9 = vld [vmem:[#allocation7 + $0x48] sm:$0xff] }
  0x5b   :  { %518 = vmatprep.subr.bf16.mxu0 %v517_v27  ;;  %v198_v10 = vld [vmem:[#allocation7 + $0x58] sm:$0xff]  ;;  %538 = vmatprep.subr.bf16.mxu1 %v537_v2  ;;  %v603_v11 = vpack.c.bf16 %v328_v8, %v326_v6  ;;  %v331_v13 = vld [vmem:[#allocation8 + $0x48] sm:$0xff]  ;;  %v195_v15 = vld [vmem:[#allocation7 + $0x40] sm:$0xff] }
  0x5c   :  { %v541_v12 = vpack.c.bf16 %v198_v10, %v196_v9  ;;  %v333_v14 = vld [vmem:[#allocation8 + $0x58] sm:$0xff]  ;;  %v197_v17 = vld [vmem:[#allocation7 + $0x50] sm:$0xff]  ;;  %v330_v18 = vld [vmem:[#allocation8 + $0x40] sm:$0xff] }
  0x5d   :  { %v605_v16 = vpack.c.bf16 %v333_v14, %v331_v13  ;;  %v332_v19 = vld [vmem:[#allocation8 + $0x50] sm:$0xff]  ;;  %v543_v20 = vpack.c.bf16 %v197_v17, %v195_v15  ;;  %v200_v21 = vld [vmem:[#allocation7 + $0x68] sm:$0xff]  ;;  %v202_v22 = vld [vmem:[#allocation7 + $0x78] sm:$0xff] }
  0x5e   :  { %520 = vmatpush1.bf16.msra.mxu0 %v519_v32  ;;  %540 = vmatpush1.bf16.msra.mxu1 %v539_v7  ;;  %v335_v23 = vld [vmem:[#allocation8 + $0x68] sm:$0xff]  ;;  %v607_v24 = vpack.c.bf16 %v332_v19, %v330_v18  ;;  %v545_v25 = vpack.c.bf16 %v202_v22, %v200_v21  ;;  %v337_v26 = vld [vmem:[#allocation8 + $0x78] sm:$0xff]  ;;  %v199_v27 = vld [vmem:[#allocation7 + $0x60] sm:$0xff] }
  0x5f   :  { %522 = vmatprep.subr.bf16.mxu0 %v521_v33  ;;  %542 = vmatprep.subr.bf16.mxu1 %v541_v12  ;;  %v201_v28 = vld [vmem:[#allocation7 + $0x70] sm:$0xff]  ;;  %v609_v29 = vpack.c.bf16 %v337_v26, %v335_v23  ;;  %v334_v30 = vld [vmem:[#allocation8 + $0x60] sm:$0xff]  ;;  %v204_v32 = vld [vmem:[#allocation7 + $0x88] sm:$0xff] }
  0x60   :  { %v336_v31 = vld [vmem:[#allocation8 + $0x70] sm:$0xff]  ;;  %v206_v33 = vld [vmem:[#allocation7 + $0x98] sm:$0xff]  ;;  %v339_v34 = vld [vmem:[#allocation8 + $0x88] sm:$0xff]  ;;  %v547_v36 = vpack.c.bf16 %v201_v28, %v199_v27 }
  0x61   :  { %v341_v35 = vld [vmem:[#allocation8 + $0x98] sm:$0xff]  ;;  %v611_v37 = vpack.c.bf16 %v336_v31, %v334_v30  ;;  %v205_v40 = vld [vmem:[#allocation7 + $0x90] sm:$0xff]  ;;  %v338_v41 = vld [vmem:[#allocation8 + $0x80] sm:$0xff] }
  0x62   :  { %524 = vmatpush1.bf16.msra.mxu0 %v523_v38  ;;  %544 = vmatpush1.bf16.msra.mxu1 %v543_v20  ;;  %v549_v38 = vpack.c.bf16 %v206_v33, %v204_v32  ;;  %v613_v42 = vpack.c.bf16 %v341_v35, %v339_v34  ;;  %v340_v43 = vld [vmem:[#allocation8 + $0x90] sm:$0xff]  ;;  %v343_v46 = vld [vmem:[#allocation8 + $0xa8] sm:$0xff]  ;;  %v345_v47 = vld [vmem:[#allocation8 + $0xb8] sm:$0xff] }
  0x63   :  { %526 = vmatprep.subr.bf16.mxu0 %v525_v39  ;;  %546 = vmatprep.subr.bf16.mxu1 %v545_v25  ;;  %v203_v39 = vld [vmem:[#allocation7 + $0x80] sm:$0xff]  ;;  %v209_v52 = vld [vmem:[#allocation7 + $0xb0] sm:$0xff]  ;;  %v617_v54 = vpack.c.bf16 %v345_v47, %v343_v46  ;;  %v212_v56 = vld [vmem:[#allocation7 + $0xc8] sm:$0xff] }
  0x64   :  { %v207_v51 = vld [vmem:[#allocation7 + $0xa0] sm:$0xff]  ;;  %v344_v55 = vld [vmem:[#allocation8 + $0xb0] sm:$0xff]  ;;  %v347_v58 = vld [vmem:[#allocation8 + $0xc8] sm:$0xff] }
  0x65   :  { %v342_v53 = vld [vmem:[#allocation8 + $0xa0] sm:$0xff]  ;;  %v349_v59 = vld [vmem:[#allocation8 + $0xd8] sm:$0xff]  ;;  %v555_v60 = vpack.c.bf16 %v209_v52, %v207_v51  ;;  %v213_v0 = vld [vmem:[#allocation7 + $0xd0] sm:$0xff] }
  0x66   :  { %528 = vmatpush1.bf16.msra.mxu0 %v527_v44  ;;  %v208_v44 = vld [vmem:[#allocation7 + $0xa8] sm:$0xff]  ;;  %548 = vmatpush1.bf16.msra.mxu1 %v547_v36  ;;  %v619_v61 = vpack.c.bf16 %v344_v55, %v342_v53  ;;  %v211_v63 = vld [vmem:[#allocation7 + $0xc0] sm:$0xff]  ;;  %v621_v2 = vpack.c.bf16 %v349_v59, %v347_v58  ;;  %v218_v5 = vld [vmem:[#allocation7 + $0xf8] sm:$0xff] }
  0x67   :  { %530 = vmatprep.subr.bf16.mxu0 %v529_v45  ;;  %v210_v45 = vld [vmem:[#allocation7 + $0xb8] sm:$0xff]  ;;  %550 = vmatprep.subr.bf16.mxu1 %v549_v38  ;;  %v346_v1 = vld [vmem:[#allocation8 + $0xc0] sm:$0xff]  ;;  %v216_v4 = vld [vmem:[#allocation7 + $0xe8] sm:$0xff]  ;;  %v559_v8 = vpack.c.bf16 %v213_v0, %v211_v63 }
  0x68   :  { %v553_v50 = vpack.c.bf16 %v210_v45, %v208_v44  ;;  %v351_v6 = vld [vmem:[#allocation8 + $0xe8] sm:$0xff]  ;;  %v353_v7 = vld [vmem:[#allocation8 + $0xf8] sm:$0xff]  ;;  %v561_v10 = vpack.c.bf16 %v218_v5, %v216_v4  ;;  %v217_v12 = vld [vmem:[#allocation7 + $0xf0] sm:$0xff] }
  0x69   :  { %v350_v13 = vld [vmem:[#allocation8 + $0xe0] sm:$0xff]  ;;  %v625_v14 = vpack.c.bf16 %v353_v7, %v351_v6  ;;  %v352_v15 = vld [vmem:[#allocation8 + $0xf0] sm:$0xff]  ;;  %v222_v17 = vld [vmem:[#allocation7 + $0x118] sm:$0xff] }
  0x6a   :  { %532 = vmatpush1.bf16.msra.mxu0 %v531_v48  ;;  %v551_v48 = vpack.c.bf16 %v205_v40, %v203_v39  ;;  %v355_v18 = vld [vmem:[#allocation8 + $0x108] sm:$0xff]  ;;  %v357_v19 = vld [vmem:[#allocation8 + $0x118] sm:$0xff]  ;;  %v627_v21 = vpack.c.bf16 %v352_v15, %v350_v13  ;;  %v219_v23 = vld [vmem:[#allocation7 + $0x100] sm:$0xff] }
  0x6b   :  { %598 = vmatprep.subr.bf16.mxu0 %v597_v57  ;;  %v214_v57 = vld [vmem:[#allocation7 + $0xd8] sm:$0xff]  ;;  %v354_v25 = vld [vmem:[#allocation8 + $0x100] sm:$0xff]  ;;  %v629_v26 = vpack.c.bf16 %v357_v19, %v355_v18  ;;  %v356_v27 = vld [vmem:[#allocation8 + $0x110] sm:$0xff] }
  0x6c   :  { %552 = vmatpush1.bf16.msra.mxu1 %v551_v48  ;;  %v224_v28 = vld [vmem:[#allocation7 + $0x128] sm:$0xff]  ;;  %v361_v31 = vld [vmem:[#allocation8 + $0x138] sm:$0xff]  ;;  %v631_v33 = vpack.c.bf16 %v356_v27, %v354_v25  ;;  %v223_v35 = vld [vmem:[#allocation7 + $0x120] sm:$0xff] }
  0x6d   :  { %169 = vmatmul.mubr.f32.vlgmr.msra.gmra.mrb[0].mxu0 %v71_v49  ;;  %v615_v49 = vpack.c.bf16 %v340_v43, %v338_v41  ;;  %554 = vmatprep.subr.bf16.mxu1 %v553_v50  ;;  %v359_v30 = vld [vmem:[#allocation8 + $0x128] sm:$0xff]  ;;  %v225_v36 = vld [vmem:[#allocation7 + $0x130] sm:$0xff]  ;;  %v230_v41 = vld [vmem:[#allocation7 + $0x158] sm:$0xff] }
  0x6e   :  { %600 = vmatpush1.bf16.msra.mxu0 %v599_v62  ;;  %v557_v62 = vpack.c.bf16 %v214_v57, %v212_v56  ;;  %v633_v38 = vpack.c.bf16 %v361_v31, %v359_v30  ;;  %v360_v39 = vld [vmem:[#allocation8 + $0x130] sm:$0xff]  ;;  %v228_v40 = vld [vmem:[#allocation7 + $0x148] sm:$0xff]  ;;  %v365_v43 = vld [vmem:[#allocation8 + $0x158] sm:$0xff]  ;;  %v571_v44 = vpack.c.bf16 %v225_v36, %v223_v35 }
  0x6f   :  { %602 = vmatprep.subr.bf16.mxu0 %v601_v3  ;;  %v348_v3 = vld [vmem:[#allocation8 + $0xd0] sm:$0xff]  ;;  %v573_v46 = vpack.c.bf16 %v230_v41, %v228_v40  ;;  %v227_v47 = vld [vmem:[#allocation7 + $0x140] sm:$0xff]  ;;  %v232_v52 = vld [vmem:[#allocation7 + $0x168] sm:$0xff] }
  0x70   :  { %556 = vmatpush1.bf16.msra.mxu1 %v555_v60  ;;  %v623_v9 = vpack.c.bf16 %v348_v3, %v346_v1  ;;  %v229_v48 = vld [vmem:[#allocation7 + $0x150] sm:$0xff]  ;;  %v234_v53 = vld [vmem:[#allocation7 + $0x178] sm:$0xff]  ;;  %v231_v59 = vld [vmem:[#allocation7 + $0x160] sm:$0xff] }
  0x71   :  { %558 = vmatprep.subr.bf16.mxu1 %v557_v62  ;;  %v364_v51 = vld [vmem:[#allocation8 + $0x150] sm:$0xff]  ;;  %v369_v55 = vld [vmem:[#allocation8 + $0x178] sm:$0xff]  ;;  %v575_v56 = vpack.c.bf16 %v229_v48, %v227_v47  ;;  %v577_v58 = vpack.c.bf16 %v234_v53, %v232_v52  ;;  %v366_v62 = vld [vmem:[#allocation8 + $0x160] sm:$0xff] }
  0x72   :  { %604 = vmatpush1.bf16.msra.mxu0 %v603_v11  ;;  %v215_v11 = vld [vmem:[#allocation7 + $0xe0] sm:$0xff]  ;;  %v233_v60 = vld [vmem:[#allocation7 + $0x170] sm:$0xff]  ;;  %v236_v7 = vld [vmem:[#allocation7 + $0x188] sm:$0xff] }
  0x73   :  { %606 = vmatprep.subr.bf16.mxu0 %v605_v16  ;;  %v220_v16 = vld [vmem:[#allocation7 + $0x108] sm:$0xff]  ;;  %v563_v20 = vpack.c.bf16 %v217_v12, %v215_v11  ;;  %v368_v63 = vld [vmem:[#allocation8 + $0x170] sm:$0xff]  ;;  %v579_v0 = vpack.c.bf16 %v233_v60, %v231_v59  ;;  %v373_v11 = vld [vmem:[#allocation8 + $0x198] sm:$0xff] }
  0x74   :  { %560 = vmatpush1.bf16.msra.mxu1 %v559_v8  ;;  %v565_v22 = vpack.c.bf16 %v222_v17, %v220_v16  ;;  %v643_v1 = vpack.c.bf16 %v368_v63, %v366_v62  ;;  %v238_v8 = vld [vmem:[#allocation7 + $0x198] sm:$0xff]  ;;  %v235_v12 = vld [vmem:[#allocation7 + $0x180] sm:$0xff]  ;;  %v237_v13 = vld [vmem:[#allocation7 + $0x190] sm:$0xff] }
  0x75   :  { %562 = vmatprep.subr.bf16.mxu1 %v561_v10  ;;  %v581_v10 = vpack.c.bf16 %v238_v8, %v236_v7  ;;  %v583_v15 = vpack.c.bf16 %v237_v13, %v235_v12  ;;  %v370_v16 = vld [vmem:[#allocation8 + $0x180] sm:$0xff]  ;;  %v372_v17 = vld [vmem:[#allocation8 + $0x190] sm:$0xff]  ;;  %v240_v19 = vld [vmem:[#allocation7 + $0x1a8] sm:$0xff] }
  0x76   :  { %608 = vmatpush1.bf16.msra.mxu0 %v607_v24  ;;  %v221_v24 = vld [vmem:[#allocation7 + $0x110] sm:$0xff]  ;;  %v647_v18 = vpack.c.bf16 %v372_v17, %v370_v16  ;;  %v244_v31 = vld [vmem:[#allocation7 + $0x1c8] sm:$0xff]  ;;  %v381_v35 = vld [vmem:[#allocation8 + $0x1d8] sm:$0xff] }
  0x77   :  { %610 = vmatprep.subr.bf16.mxu0 %v609_v29  ;;  %v226_v29 = vld [vmem:[#allocation7 + $0x138] sm:$0xff]  ;;  %v567_v32 = vpack.c.bf16 %v221_v24, %v219_v23  ;;  %v239_v24 = vld [vmem:[#allocation7 + $0x1a0] sm:$0xff]  ;;  %v241_v25 = vld [vmem:[#allocation7 + $0x1b0] sm:$0xff] }
  0x78   :  { %564 = vmatpush1.bf16.msra.mxu1 %v563_v20  ;;  %v569_v34 = vpack.c.bf16 %v226_v29, %v224_v28  ;;  %v242_v20 = vld [vmem:[#allocation7 + $0x1b8] sm:$0xff]  ;;  %v587_v27 = vpack.c.bf16 %v241_v25, %v239_v24  ;;  %v374_v28 = vld [vmem:[#allocation8 + $0x1a0] sm:$0xff]  ;;  %v376_v29 = vld [vmem:[#allocation8 + $0x1b0] sm:$0xff] }
  0x79   :  { %566 = vmatprep.subr.bf16.mxu1 %v565_v22  ;;  %v585_v22 = vpack.c.bf16 %v242_v20, %v240_v19  ;;  %v377_v23 = vld [vmem:[#allocation8 + $0x1b8] sm:$0xff]  ;;  %v651_v30 = vpack.c.bf16 %v376_v29, %v374_v28  ;;  %v243_v36 = vld [vmem:[#allocation7 + $0x1c0] sm:$0xff]  ;;  %v380_v41 = vld [vmem:[#allocation8 + $0x1d0] sm:$0xff] }
  0x7a   :  { %612 = vmatpush1.bf16.msra.mxu0 %v611_v37  ;;  %v358_v37 = vld [vmem:[#allocation8 + $0x120] sm:$0xff]  ;;  %v384_v53 = vld [vmem:[#allocation8 + $0x1f0] sm:$0xff] }
  0x7b   :  { %614 = vmatprep.subr.bf16.mxu0 %v613_v42  ;;  %v363_v42 = vld [vmem:[#allocation8 + $0x148] sm:$0xff]  ;;  %v635_v45 = vpack.c.bf16 %v360_v39, %v358_v37  ;;  %v245_v37 = vld [vmem:[#allocation7 + $0x1d0] sm:$0xff]  ;;  %v378_v40 = vld [vmem:[#allocation8 + $0x1c0] sm:$0xff] }
  0x7c   :  { %568 = vmatpush1.bf16.msra.mxu1 %v567_v32  ;;  %v637_v50 = vpack.c.bf16 %v365_v43, %v363_v42  ;;  %v246_v32 = vld [vmem:[#allocation7 + $0x1d8] sm:$0xff]  ;;  %v591_v39 = vpack.c.bf16 %v245_v37, %v243_v36  ;;  %v248_v42 = vld [vmem:[#allocation7 + $0x1e8] sm:$0xff]  ;;  %v655_v43 = vpack.c.bf16 %v380_v41, %v378_v40 }
  0x7d   :  { %570 = vmatprep.subr.bf16.mxu1 %v569_v34  ;;  %v589_v34 = vpack.c.bf16 %v246_v32, %v244_v31 }
  0x7e   :  { %616 = vmatpush1.bf16.msra.mxu0 %v615_v49  ;;  %v362_v49 = vld [vmem:[#allocation8 + $0x140] sm:$0xff] }
  0x7f   :  { %618 = vmatprep.subr.bf16.mxu0 %v617_v54  ;;  %v367_v54 = vld [vmem:[#allocation8 + $0x168] sm:$0xff]  ;;  %v639_v57 = vpack.c.bf16 %v364_v51, %v362_v49  ;;  %v247_v49 = vld [vmem:[#allocation7 + $0x1e0] sm:$0xff] }
  0x80   :  { %572 = vmatpush1.bf16.msra.mxu1 %v571_v44  ;;  %v250_v44 = vld [vmem:[#allocation7 + $0x1f8] sm:$0xff]  ;;  %v382_v51 = vld [vmem:[#allocation8 + $0x1e0] sm:$0xff] }
  0x81   :  { %574 = vmatprep.subr.bf16.mxu1 %v573_v46  ;;  %v385_v46 = vld [vmem:[#allocation8 + $0x1f8] sm:$0xff]  ;;  %v593_v47 = vpack.c.bf16 %v250_v44, %v248_v42 }
  0x82   :  { %620 = vmatpush1.bf16.msra.mxu0 %v619_v61  ;;  %v641_v61 = vpack.c.bf16 %v369_v55, %v367_v54  ;;  %v659_v54 = vpack.c.bf16 %v384_v53, %v382_v51 }
  0x83   :  { %622 = vmatprep.subr.bf16.mxu0 %v621_v2 }
  0x84   :  { %576 = vmatpush1.bf16.msra.mxu1 %v575_v56 }
  0x85   :  { %578 = vmatprep.subr.bf16.mxu1 %v577_v58 }
  0x86   :  { %624 = vmatpush1.bf16.msra.mxu0 %v623_v9  ;;  %v371_v9 = vld [vmem:[#allocation8 + $0x188] sm:$0xff] }
  0x87   :  { %626 = vmatprep.subr.bf16.mxu0 %v625_v14  ;;  %v645_v14 = vpack.c.bf16 %v373_v11, %v371_v9 }
  0x88   :  { %580 = vmatpush1.bf16.msra.mxu1 %v579_v0 }
  0x89   :  { %582 = vmatprep.subr.bf16.mxu1 %v581_v10 }
  0x8a   :  { %628 = vmatpush1.bf16.msra.mxu0 %v627_v21  ;;  %v375_v21 = vld [vmem:[#allocation8 + $0x1a8] sm:$0xff] }
  0x8b   :  { %630 = vmatprep.subr.bf16.mxu0 %v629_v26  ;;  %v649_v26 = vpack.c.bf16 %v377_v23, %v375_v21 }
  0x8c   :  { %584 = vmatpush1.bf16.msra.mxu1 %v583_v15 }
  0x8d   :  { %586 = vmatprep.subr.bf16.mxu1 %v585_v22 }
  0x8e   :  { %632 = vmatpush1.bf16.msra.mxu0 %v631_v33  ;;  %v379_v33 = vld [vmem:[#allocation8 + $0x1c8] sm:$0xff] }
  0x8f   :  { %634 = vmatprep.subr.bf16.mxu0 %v633_v38  ;;  %v653_v38 = vpack.c.bf16 %v381_v35, %v379_v33 }
  0x90   :  { %588 = vmatpush1.bf16.msra.mxu1 %v587_v27 }
  0x91   :  { %590 = vmatprep.subr.bf16.mxu1 %v589_v34 }
  0x92   :  { %636 = vmatpush1.bf16.msra.mxu0 %v635_v45  ;;  %v383_v45 = vld [vmem:[#allocation8 + $0x1e8] sm:$0xff] }
  0x93   :  { %638 = vmatprep.subr.bf16.mxu0 %v637_v50  ;;  %v657_v48 = vpack.c.bf16 %v385_v46, %v383_v45  ;;  %v249_v50 = vld [vmem:[#allocation7 + $0x1f0] sm:$0xff] }
  0x94   :  { %592 = vmatpush1.bf16.msra.mxu1 %v591_v39  ;;  %v595_v52 = vpack.c.bf16 %v249_v50, %v247_v49 }
  0x95   :  { %594 = vmatprep.subr.bf16.mxu1 %v593_v47 }
  0x96   :  { %640 = vmatpush1.bf16.msra.mxu0 %v639_v57 }
  0x97   :  { %642 = vmatprep.subr.bf16.mxu0 %v641_v61 }
  0x98   :  { %596 = vmatpush1.bf16.msra.mxu1 %v595_v52 }
  0x9a   :  { %644 = vmatpush1.bf16.msra.mxu0 %v643_v1 }
  0x9b   :  { %646 = vmatprep.subr.bf16.mxu0 %v645_v14 }
  0x9e   :  { %648 = vmatpush1.bf16.msra.mxu0 %v647_v18 }
  0x9f   :  { %650 = vmatprep.subr.bf16.mxu0 %v649_v26 }
  0xa2   :  { %652 = vmatpush1.bf16.msra.mxu0 %v651_v30 }
  0xa3   :  { %654 = vmatprep.subr.bf16.mxu0 %v653_v38 }
  0xa6   :  { %656 = vmatpush1.bf16.msra.mxu0 %v655_v43 }
  0xa7   :  { %658 = vmatprep.subr.bf16.mxu0 %v657_v48 }
  0xaa   :  { %660 = vmatpush1.bf16.msra.mxu0 %v659_v54 }
 0x140   :  { %v887_v2 = vpop.f32.mrb[0].mxu0 }
 0x141   :  { %v889_v3 = vpop.f32.mrb[1].mxu0  ;;  %v176_v4 = vsel %vm175_vm0, %v887_v2, -inf }
 0x142   :  { %v177_v5 = vsel %vm175_vm0, %v889_v3, -inf }
 0x143   :  { %v178_v6 = vmax.f32 %v176_v4, %v177_v5  ;;  %v803_v4 = vmov 1966171168   ;;  %v467_v5 = vlaneseq }
 0x145   :  { %179 = vmax.xlane.f32.xlu0 %v178_v6  ;;  %v468_v6 = vshrl.u32 %v467_v5, 7  ;;  %vm481_vm1 = vcmp.lt.s32.totalorder %v467_v5, 256 }
 0x1d2   :  { %v180_v55 = vpop.xlane.xlu0 %179 }
 0x1d3   :  { %v181_v56 = vsub.f32 %v887_v2, %v180_v55  ;;  %v182_v57 = vsub.f32 %v889_v3, %v180_v55  ;;  %v465_v2 = vunpack.c.l.s4 %v803_v4 }
 0x1d5   :  { %v183_v58 = vmul.f32 1.442695, %v181_v56  ;;  %v185_v59 = vmul.f32 1.442695, %v182_v57  ;;  %v466_v3 = vunpack.c.0.s8 %v465_v2 }
 0x1d7   :  { %670 = vpow2.f32 %v183_v58  ;;  %v469_v11 = vsub.s32 %v466_v3, %v468_v6 }
 0x1d8   :  { %672 = vpow2.f32 %v185_v59 }
 0x1e1   :  { %v671_v60 = vpop.eup %670 }
 0x1e2   :  { %v673_v61 = vpop.eup %672 }
 0x1e3   :  { %315 = vmatprep.mubr.f32.mxu1 %v673_v61  ;;  %450 = vmatprep.mubr.f32.mxu0 %v673_v61 }
 0x1e4   :  { %316 = vmatmul.mubr.f32.vlgmr.msra.gmra.mrb[0].mxu1 %v671_v60  ;;  %451 = vmatmul.mubr.f32.vlgmr.msra.gmra.mrb[2].mxu0 %v671_v60 }
 0x2b7   :  { %v317_v62 = vpop.f32.mrb[0].mxu1  ;;  %v452_v63 = vpop.f32.mrb[2].mxu0 }
 0x2b8   :  { %674 = vrcp.f32 %v452_v63  ;;  %v319_v0 = vpop.f32.mrb[1].mxu1  ;;  %v454_v1 = vpop.f32.mrb[3].mxu0 }
 0x2b9   :  { %676 = vrcp.f32 %v454_v1 }
 0x2c2   :  { %v675_v7 = vpop.eup %674 }
 0x2c3   :  { %v677_v8 = vpop.eup %676  ;;  %v459_v9 = vmul.f32 %v675_v7, %v317_v62 }
 0x2c4   :  { %v460_v10 = vmul.f32 %v677_v8, %v319_v0 }
 0x2c6   :  { %v463_v12 = vcombine.low %v459_v9, %v460_v10 }
 0x2c8   :  { %v470_v13 = vrot.slane %v463_v12, %v469_v11 }
 0x2ca   :  { %v477_v14 = vrot.slane %v470_v13, %v469_v11 }
 0x2cc   :  { %483 = vst.msk [vmem:[#allocation10] sm:$0x3] %vm481_vm1, %v477_v14 }
 0x2cd   :  { %777 = shalt.err (!%p774_p8)
}
 0x2ce   :  { %s778_s14 = scalar_lea.hbm %s911_s4, 32 }
 0x2cf   :  { %p779_p9 = scmp.ne.s32.totalorder %s911_s4, %s778_s14  ;;  %p782_p10 = scmp.lt.u32.totalorder %s778_s14, %s911_s4 }
 0x2d1   :  { %p784_p11 = pnand %p782_p10, %p779_p9 }
 0x2d3   :  { %787 = shalt.err (!%p784_p11)
}
 0x2d4   :  { %493 = dma.vmem_to_hbm [thread:$0]  %s491_s25, 32, %s911_s4, [#allocation4]  }
 0x2d5   :  { %794 = dma.done.wait [#allocation4], 32  }
 0x2d6   :  { %795 = vsyncadd [#allocation4], 4294967264 }
 0x2d7   :  { %497 = vsyncpa [#allocation3], 1 }
 0x2d8   :  { %498 = vsyncpa [#allocation6], 1 }
 0x2d9   :  { %499 = vsyncpa [#allocation9], 1 }
 0x2da   :  { %500 = vsyncpa [#allocation4], 1 }

</bundles_post_ra>
